<compile_context>
chip_gen: v5e
topology: v5e:2x2
jax: 0.10.0
libtpu: 0.0.40
codegen_flags: <defaults>
</compile_context>

<pallas_src>
import functools

import jax
import jax.numpy as jnp
from jax.experimental import pallas as pl
from jax.experimental.pallas import tpu as pltpu


def _round_up(v, m):
    return (v + m - 1) // m * m


def _mlp_eval_kernel(x_ref, w_ref, b_ref, o_ref, acc_ref, *, neg_slope):
    # grid = (i: batch tiles, j: hidden tiles, k: in-feature reduction tiles)
    k = pl.program_id(2)

    @pl.when(k == 0)
    def _():
        acc_ref[...] = jnp.zeros_like(acc_ref)

    # x tile: (tm, tk), w tile (pre-transposed): (tk, tn) -> MXU, f32 accumulate.
    acc_ref[...] += jnp.dot(x_ref[...], w_ref[...],
                            preferred_element_type=jnp.float32)

    @pl.when(k == pl.num_programs(2) - 1)
    def _():
        # Bias + LeakyReLU epilogue done exactly once, in f32, at finalize.
        y = acc_ref[...] + b_ref[...]
        o_ref[...] = jnp.where(y >= 0.0, y, neg_slope * y).astype(o_ref.dtype)


def _mlp_train_kernel(x_ref, w_ref, b_ref, m_ref, o_ref, acc_ref, *, neg_slope):
    k = pl.program_id(2)

    @pl.when(k == 0)
    def _():
        acc_ref[...] = jnp.zeros_like(acc_ref)

    acc_ref[...] += jnp.dot(x_ref[...], w_ref[...],
                            preferred_element_type=jnp.float32)

    @pl.when(k == pl.num_programs(2) - 1)
    def _():
        # m_ref already carries keep * 1/(1-p), so dropout is a single multiply.
        y = (acc_ref[...] + b_ref[...]) * m_ref[...]
        o_ref[...] = jnp.where(y >= 0.0, y, neg_slope * y).astype(o_ref.dtype)


def mlp_forward(x, w, b, *, dropout_p=0.0, training=False, key=None,
                neg_slope=0.01, tm=256, tn=512, tk=512):
    """Pallas TPU implementation of MLP.forward: LeakyReLU(Dropout(Linear(x)))."""
    B, F = x.shape
    H, F2 = w.shape
    assert F == F2, "weight in-features mismatch"

    # Tile sizes: multiples of (8, 128), capped at the padded problem size.
    # Conservative defaults (~a few MiB double-buffered) fit v5e/v6e/v7x VMEM.
    tm = min(tm, _round_up(B, 8))
    tn = min(tn, _round_up(H, 128))
    tk = min(tk, _round_up(F, 128))
    B_pad = _round_up(B, tm)
    H_pad = _round_up(H, tn)
    F_pad = _round_up(F, tk)

    # Wrapper-side layout plumbing (free): transpose W to (F, H) so the kernel
    # contracts with a plain dot, and zero-pad everything so the output lane
    # dimension is a dense multiple of 128 (unmasked vector stores).
    wt_p = jnp.pad(w.T, ((0, F_pad - F), (0, H_pad - H)))
    x_p = jnp.pad(x, ((0, B_pad - B), (0, F_pad - F)))
    b_p = jnp.pad(b, (0, H_pad - H)).reshape(1, H_pad)

    grid = (B_pad // tm, H_pad // tn, F_pad // tk)
    itemsize = jnp.dtype(x.dtype).itemsize
    cost = pl.CostEstimate(
        flops=2 * B * H * F,
        transcendentals=0,
        bytes_accessed=(B * F + H * F + B * H + H) * itemsize,
    )
    compiler_params = pltpu.CompilerParams(
        dimension_semantics=("parallel", "parallel", "arbitrary"))

    x_spec = pl.BlockSpec((tm, tk), lambda i, j, k: (i, k))
    w_spec = pl.BlockSpec((tk, tn), lambda i, j, k: (k, j))
    b_spec = pl.BlockSpec((1, tn), lambda i, j, k: (0, j))
    o_spec = pl.BlockSpec((tm, tn), lambda i, j, k: (i, j))
    out_shape = jax.ShapeDtypeStruct((B_pad, H_pad), x.dtype)
    scratch = [pltpu.VMEM((tm, tn), jnp.float32)]

    if training and dropout_p > 0.0:
        if key is None:
            key = jax.random.PRNGKey(0)
        keep = jax.random.bernoulli(key, 1.0 - dropout_p, (B, H))
        mask = keep.astype(jnp.float32) / (1.0 - dropout_p)
        mask_p = jnp.pad(mask, ((0, B_pad - B), (0, H_pad - H)),
                         constant_values=1.0)
        m_spec = pl.BlockSpec((tm, tn), lambda i, j, k: (i, j))
        out = pl.pallas_call(
            functools.partial(_mlp_train_kernel, neg_slope=neg_slope),
            out_shape=out_shape,
            grid=grid,
            in_specs=[x_spec, w_spec, b_spec, m_spec],
            out_specs=o_spec,
            scratch_shapes=scratch,
            compiler_params=compiler_params,
            cost_estimate=cost,
        )(x_p, wt_p, b_p, mask_p)
    else:
        out = pl.pallas_call(
            functools.partial(_mlp_eval_kernel, neg_slope=neg_slope),
            out_shape=out_shape,
            grid=grid,
            in_specs=[x_spec, w_spec, b_spec],
            out_specs=o_spec,
            scratch_shapes=scratch,
            compiler_params=compiler_params,
            cost_estimate=cost,
        )(x_p, wt_p, b_p)

    return out[:B, :H]


def init_mlp_params(key, in_size, hid_size, dtype=jnp.float32):
    """Deterministic init mimicking nn.Linear's default (uniform +/- 1/sqrt(fan_in))."""
    kw, kb = jax.random.split(key)
    bound = 1.0 / (in_size ** 0.5)
    w = jax.random.uniform(kw, (hid_size, in_size), dtype, -bound, bound)
    b = jax.random.uniform(kb, (hid_size,), dtype, -bound, bound)
    return w, b


if __name__ == "__main__":
    in_size, hid_size, dropout_p = 32, 64, 0.1
    batch = 8

    key = jax.random.PRNGKey(0)
    kx, kp, kd = jax.random.split(key, 3)
    x = jax.random.normal(kx, (batch, in_size), dtype=jnp.float32)
    w, b = init_mlp_params(kp, in_size, hid_size)

    # Eval-mode forward (dropout = identity), deterministic.
    out = jax.block_until_ready(
        mlp_forward(x, w, b, dropout_p=dropout_p, training=False))
    ref = x @ w.T + b
    ref = jnp.where(ref >= 0.0, ref, 0.01 * ref)
    assert out.shape == (batch, hid_size)
    assert jnp.allclose(out, ref, atol=1e-5, rtol=1e-5), "eval mismatch vs reference"

    # Training-mode forward (inverted dropout) — compare against the same mask.
    out_tr = jax.block_until_ready(
        mlp_forward(x, w, b, dropout_p=dropout_p, training=True, key=kd))
    keep = jax.random.bernoulli(kd, 1.0 - dropout_p, (batch, hid_size))
    ref_tr = (x @ w.T + b) * keep.astype(jnp.float32) / (1.0 - dropout_p)
    ref_tr = jnp.where(ref_tr >= 0.0, ref_tr, 0.01 * ref_tr)
    assert out_tr.shape == (batch, hid_size)
    assert jnp.allclose(out_tr, ref_tr, atol=1e-5, rtol=1e-5), "train mismatch vs reference"

    print("KERNEL_OK")
</pallas_src>

<mosaic_0001>
module attributes {stable_mosaic.version = 11 : i64} {
  func.func @_mlp_eval_kernel(%arg0: i32, %arg1: i32, %arg2: i32, %arg3: memref<8x128xf32, #tpu.memory_space<vmem>>, %arg4: memref<128x128xf32, #tpu.memory_space<vmem>>, %arg5: memref<1x128xf32, #tpu.memory_space<vmem>>, %arg6: memref<8x128xf32, #tpu.memory_space<vmem>>, %arg7: memref<8x128xf32, #tpu.memory_space<vmem>>) attributes {dimension_semantics = [#tpu.dimension_semantics<parallel>, #tpu.dimension_semantics<parallel>, #tpu.dimension_semantics<arbitrary>], iteration_bounds = array<i64: 1, 1, 1>, scalar_prefetch = 0 : i64, scratch_operands = 1 : i64, tpu.core_type = #tpu.core_type<tc>, window_params = [{transform_indices = @transform_0, window_bounds = array<i64: 8, 128>}, {transform_indices = @transform_1, window_bounds = array<i64: 128, 128>}, {transform_indices = @transform_2, window_bounds = array<i64: 1, 128>}, {transform_indices = @transform_3, window_bounds = array<i64: 8, 128>}]} {
    %c0_i32 = arith.constant 0 : i32
    %0 = arith.cmpi eq, %arg2, %c0_i32 : i32
    %1 = arith.extui %0 : i1 to i32
    %c0_i32_0 = arith.constant 0 : i32
    %2 = arith.cmpi ne, %1, %c0_i32_0 : i32
    scf.if %2 {
      %cst_10 = arith.constant 0.000000e+00 : f32
      %12 = vector.broadcast %cst_10 : f32 to vector<8x128xf32>
      %c0_11 = arith.constant 0 : index
      %c0_12 = arith.constant 0 : index
      %13 = vector.load %arg7[%c0_11, %c0_12] : memref<8x128xf32, #tpu.memory_space<vmem>>, vector<8x128xf32>
      tpu.vector_store %arg7[%c0_11, %c0_12], %12 {strides = array<i32>} : memref<8x128xf32, #tpu.memory_space<vmem>>, vector<8x128xf32>,
    } else {
    }
    %c0 = arith.constant 0 : index
    %c0_1 = arith.constant 0 : index
    %3 = vector.load %arg7[%c0, %c0_1] : memref<8x128xf32, #tpu.memory_space<vmem>>, vector<8x128xf32>
    %c0_2 = arith.constant 0 : index
    %c0_3 = arith.constant 0 : index
    %4 = vector.load %arg3[%c0_2, %c0_3] : memref<8x128xf32, #tpu.memory_space<vmem>>, vector<8x128xf32>
    %c0_4 = arith.constant 0 : index
    %c0_5 = arith.constant 0 : index
    %5 = vector.load %arg4[%c0_4, %c0_5] : memref<128x128xf32, #tpu.memory_space<vmem>>, vector<128x128xf32>
    %cst = arith.constant dense<0.000000e+00> : vector<8x128xf32>
    %6 = tpu.matmul %4, %5, %cst {dimension_numbers = #tpu.dot_dimension_numbers<[1], [0], [0], [1], [0, 0, 1, 1], [], []>} : vector<8x128xf32>, vector<128x128xf32>, vector<8x128xf32> -> vector<8x128xf32>
    %7 = arith.addf %3, %6 : vector<8x128xf32>
    %c0_6 = arith.constant 0 : index
    %c0_7 = arith.constant 0 : index
    %8 = vector.load %arg7[%c0_6, %c0_7] : memref<8x128xf32, #tpu.memory_space<vmem>>, vector<8x128xf32>
    tpu.vector_store %arg7[%c0_6, %c0_7], %7 {strides = array<i32>} : memref<8x128xf32, #tpu.memory_space<vmem>>, vector<8x128xf32>,
    %c0_i32_8 = arith.constant 0 : i32
    %9 = arith.cmpi eq, %arg2, %c0_i32_8 : i32
    %10 = arith.extui %9 : i1 to i32
    %c0_i32_9 = arith.constant 0 : i32
    %11 = arith.cmpi ne, %10, %c0_i32_9 : i32
    scf.if %11 {
      %c0_10 = arith.constant 0 : index
      %c0_11 = arith.constant 0 : index
      %12 = vector.load %arg7[%c0_10, %c0_11] : memref<8x128xf32, #tpu.memory_space<vmem>>, vector<8x128xf32>
      %c0_12 = arith.constant 0 : index
      %c0_13 = arith.constant 0 : index
      %13 = vector.load %arg5[%c0_12, %c0_13] : memref<1x128xf32, #tpu.memory_space<vmem>>, vector<1x128xf32>
      %14 = vector.broadcast %13 : vector<1x128xf32> to vector<8x128xf32>
      %15 = arith.addf %12, %14 : vector<8x128xf32>
      %cst_14 = arith.constant 0.000000e+00 : f32
      %16 = vector.broadcast %cst_14 : f32 to vector<8x128xf32>
      %17 = arith.cmpf oge, %15, %16 : vector<8x128xf32>
      %cst_15 = arith.constant 0.00999999977 : f32
      %18 = vector.broadcast %cst_15 : f32 to vector<8x128xf32>
      %19 = arith.mulf %18, %15 : vector<8x128xf32>
      %20 = arith.select %17, %15, %19 : vector<8x128xi1>, vector<8x128xf32>
      %c0_16 = arith.constant 0 : index
      %c0_17 = arith.constant 0 : index
      %21 = vector.load %arg6[%c0_16, %c0_17] : memref<8x128xf32, #tpu.memory_space<vmem>>, vector<8x128xf32>
      tpu.vector_store %arg6[%c0_16, %c0_17], %20 {strides = array<i32>} : memref<8x128xf32, #tpu.memory_space<vmem>>, vector<8x128xf32>,
    } else {
    }
    return
  }
  func.func @transform_0(%arg0: i32, %arg1: i32, %arg2: i32) -> (i32, i32) {
    %c0_i32 = arith.constant 0 : i32
    return %arg0, %arg2 : i32, i32
  }
  func.func @transform_1(%arg0: i32, %arg1: i32, %arg2: i32) -> (i32, i32) {
    %c0_i32 = arith.constant 0 : i32
    return %arg2, %arg1 : i32, i32
  }
  func.func @transform_2(%arg0: i32, %arg1: i32, %arg2: i32) -> (i32, i32) {
    %c0_i32 = arith.constant 0 : i32
    %c0_i32_0 = arith.constant 0 : i32
    return %c0_i32, %arg1 : i32, i32
  }
  func.func @transform_3(%arg0: i32, %arg1: i32, %arg2: i32) -> (i32, i32) {
    %c0_i32 = arith.constant 0 : i32
    return %arg0, %arg1 : i32, i32
  }
}

</mosaic_0001>

<bundles_post_ra>
// kernel: tpu_custom_call.1
= control target key start
LH: loop header
LB: loop body
LE: loop exit
PB: predicated region body
PF: predicated region fallthrough
CT: control target
= control target key end

     0   :  { %8 = vsyncpa [#allocation4], 0  ;;  %s242_s0 = inlined_call_operand.hbm [shape: f32[8,128], index: 0, kind: input, shape index: {}]   ;;  %s243_s1 = inlined_call_operand.hbm [shape: f32[128,128], index: 1, kind: input, shape index: {}]   ;;  %s244_s2 = inlined_call_operand.vmem [shape: f32[1,128], index: 2, kind: input, shape index: {}]   ;;  %s245_s3 = inlined_call_operand.hbm [shape: f32[8,128], index: 3, kind: output, shape index: {}]  }
   0x1   :  { %9 = vsyncpa [#allocation7], 0 }
   0x2   :  { %10 = vsyncpa [#allocation5], 0  ;;  %s16_s14 = sshll.u32 %s242_s0, 4  ;;  %s205_s15 = smov [#allocation3]   ;;  %s17_s14 = int_to_ptr.hbm [resolvable:$true] %s16_s14 }
   0x3   :  { %s18_s16 = sshll.u32 %s205_s15, 4  ;;  %s26_s19 = sshll.u32 %s243_s1, 4  ;;  %s19_s16 = int_to_ptr.vmem [resolvable:$true] %s18_s16  ;;  %s27_s19 = int_to_ptr.hbm [resolvable:$true] %s26_s19 }
   0x4   :  { %21 = dma.hbm_to_vmem [thread:$0]  %s17_s14, 128, %s19_s16, [#allocation4]  }
   0x5   :  { %s206_s20 = smov [#allocation6]   ;;  %s207_s22 = smov 128  }
   0x6   :  { %s28_s21 = sshll.u32 %s206_s20, 4  ;;  %s208_s23 = smov 8   ;;  %s29_s21 = int_to_ptr.vmem [resolvable:$true] %s28_s21 }
   0x7   :  { %34 = dma.hbm_to_vmem [thread:$0]  %s27_s19, 2048, %s29_s21, [#allocation7], %s207_s22, %s207_s22, %s208_s23  }
   0x8   :  { %199 = dma.done.wait [#allocation4], 128  }
   0x9   :  { %200 = vsyncadd [#allocation4], 4294967168 }
   0xa   :  { %201 = dma.done.wait [#allocation7], 2048  }
   0xb   :  { %202 = vsyncadd [#allocation7], 4294965248  ;;  %v67_v0 = vld [vmem:[#allocation6 + $0x78] sm:$0xff]  ;;  %v66_v1 = vld [vmem:[#allocation6 + $0x70] sm:$0xff]  ;;  %s209_s24 = smov [#allocation8]   ;;  %s110_s28 = sshll.u32 %s245_s3, 4  ;;  %s111_s28 = int_to_ptr.hbm [resolvable:$true] %s110_s28 }
   0xc   :  { %68 = vmatpush.msra.mxu0 %v67_v0  ;;  %v65_v2 = vld [vmem:[#allocation6 + $0x68] sm:$0xff]  ;;  %v64_v3 = vld [vmem:[#allocation6 + $0x60] sm:$0xff]  ;;  %v63_v4 = vld [vmem:[#allocation6 + $0x58] sm:$0xff]  ;;  %s108_s25 = sshll.u32 %s209_s24, 4  ;;  %s109_s25 = int_to_ptr.vmem [resolvable:$true] %s108_s25 }
   0xd   :  { %v62_v5 = vld [vmem:[#allocation6 + $0x50] sm:$0xff]  ;;  %v61_v6 = vld [vmem:[#allocation6 + $0x48] sm:$0xff]  ;;  %v60_v7 = vld [vmem:[#allocation6 + $0x40] sm:$0xff] }
   0xe   :  { %69 = vmatpush.msra.mxu0 %v66_v1  ;;  %v59_v8 = vld [vmem:[#allocation6 + $0x38] sm:$0xff]  ;;  %v58_v9 = vld [vmem:[#allocation6 + $0x30] sm:$0xff]  ;;  %v57_v10 = vld [vmem:[#allocation6 + $0x28] sm:$0xff] }
   0xf   :  { %v56_v11 = vld [vmem:[#allocation6 + $0x20] sm:$0xff]  ;;  %v55_v12 = vld [vmem:[#allocation6 + $0x18] sm:$0xff]  ;;  %v54_v13 = vld [vmem:[#allocation6 + $0x10] sm:$0xff] }
  0x10   :  { %70 = vmatpush.msra.mxu0 %v65_v2  ;;  %v53_v14 = vld [vmem:[#allocation6 + $0x8] sm:$0xff]  ;;  %v52_v15 = vld [vmem:[#allocation6] sm:$0xff]  ;;  %v51_v16 = vld [vmem:[#allocation3] sm:$0xff] }
  0x11   :  { %v126_v17 = vld [vmem:[%s244_s2] ss:$0 sm:$0xff] }
  0x12   :  { %71 = vmatpush.msra.mxu0 %v64_v3 }
  0x14   :  { %72 = vmatpush.msra.mxu0 %v63_v4 }
  0x16   :  { %73 = vmatpush.msra.mxu0 %v62_v5 }
  0x18   :  { %74 = vmatpush.msra.mxu0 %v61_v6 }
  0x1a   :  { %75 = vmatpush.msra.mxu0 %v60_v7 }
  0x1c   :  { %76 = vmatpush.msra.mxu0 %v59_v8 }
  0x1e   :  { %77 = vmatpush.msra.mxu0 %v58_v9 }
  0x20   :  { %78 = vmatpush.msra.mxu0 %v57_v10 }
  0x22   :  { %79 = vmatpush.msra.mxu0 %v56_v11 }
  0x24   :  { %80 = vmatpush.msra.mxu0 %v55_v12 }
  0x26   :  { %81 = vmatpush.msra.mxu0 %v54_v13 }
  0x28   :  { %82 = vmatpush.msra.mxu0 %v53_v14 }
  0x2a   :  { %83 = vmatpush.msra.mxu0 %v52_v15 }
  0x2b   :  { %84 = vmatmul.f32.vlgmr.msra.gmra.mxu0 %v51_v16 }
  0xa8   :  { %v85_v18 = vpop.f32.mrf.mxu0 }
  0xa9   :  { %v98_v19 = vadd.f32 %v126_v17, %v85_v18 }
  0xab   :  { %vm99_vm0 = vcmp.ge.f32.partialorder %v98_v19, 0.0  ;;  %v100_v20 = vmul.f32 0.01, %v98_v19 }
  0xad   :  { %v101_v21 = vsel %vm99_vm0, %v98_v19, %v100_v20 }
  0xae   :  { %102 = vst [vmem:[#allocation8] sm:$0xff] %v101_v21 }
  0xaf   :  { %113 = dma.vmem_to_hbm [thread:$0]  %s109_s25, 128, %s111_s28, [#allocation5]  }
  0xb0   :  { %203 = dma.done.wait [#allocation5], 128  }
  0xb1   :  { %204 = vsyncadd [#allocation5], 4294967168 }
  0xb2   :  { %118 = vsyncpa [#allocation4], 1 }
  0xb3   :  { %119 = vsyncpa [#allocation7], 1 }
  0xb4   :  { %120 = vsyncpa [#allocation5], 1 }

</bundles_post_ra>
